<compile_context>
chip_gen: v5e
topology: v5e:2x2
jax: 0.10.0
libtpu: 0.0.40
codegen_flags: <defaults>
</compile_context>

<pallas_src>
import numpy as np
import jax
import jax.numpy as jnp
from jax.experimental import pallas as pl
from jax.experimental.pallas import tpu as pltpu

_VMEM_LIMIT_BYTES = 32 * 1024 * 1024   # safe on v5e/v6e (128 MiB) and v7x (64 MiB)
_VMEM_BUDGET = 8 * 1024 * 1024         # target per-step working set
_LIVE_ARRAYS = 12                      # ~(2 in + 1 out) double-buffered + temporaries


def _sobel_core(g, g_above, g_below):
    """Separable Sobel on a (BN, 1, TH, W) tile.

    g        : (BN, 1, TH, W) gated input (ir * mask)
    g_above  : (BN, 1, 1, W)  row directly above the tile (zeros at image top)
    g_below  : (BN, 1, 1, W)  row directly below the tile (zeros at image bottom)

    All shifts are pltpu.roll + iota/where boundary masks: no concat/slice copies.
    """
    BN, _, TH, W = g.shape
    g = g.astype(jnp.float32)
    g_above = g_above.astype(jnp.float32)
    g_below = g_below.astype(jnp.float32)

    def east(a):   # a[..., w+1], zero past the right edge
        col = jax.lax.broadcasted_iota(jnp.int32, a.shape, a.ndim - 1)
        return jnp.where(col == W - 1, 0.0, pltpu.roll(a, shift=W - 1, axis=a.ndim - 1))

    def west(a):   # a[..., w-1], zero past the left edge
        col = jax.lax.broadcasted_iota(jnp.int32, a.shape, a.ndim - 1)
        return jnp.where(col == 0, 0.0, pltpu.roll(a, shift=1, axis=a.ndim - 1))

    def hpass(a):  # column taps: [-1,0,1] (diff) and [1,2,1] (smooth)
        ae, aw = east(a), west(a)
        return ae - aw, aw + 2.0 * a + ae

    diff,   smooth   = hpass(g)
    diff_a, smooth_a = hpass(g_above)
    diff_b, smooth_b = hpass(g_below)

    row = jax.lax.broadcasted_iota(jnp.int32, g.shape, 2)

    def up(a, a_above):    # a at row-1; first row comes from the halo
        return jnp.where(row == 0, a_above, pltpu.roll(a, shift=1, axis=2))

    def down(a, a_below):  # a at row+1; last row comes from the halo
        return jnp.where(row == TH - 1, a_below, pltpu.roll(a, shift=TH - 1, axis=2))

    sobelx = up(diff, diff_a) + 2.0 * diff + down(diff, diff_b)     # rows [1,2,1]
    sobely = up(smooth, smooth_a) - down(smooth, smooth_b)          # rows [1,0,-1]
    return jnp.abs(sobelx) + jnp.abs(sobely)


def _sobel_kernel_whole(ir_ref, mask_ref, o_ref):
    """Whole image(s) per grid step: zero halos == padding=1."""
    g = ir_ref[...] * mask_ref[...]
    z = jnp.zeros((g.shape[0], 1, 1, g.shape[3]), jnp.float32)
    o_ref[...] = _sobel_core(g, z, z).astype(o_ref.dtype)


def _sobel_kernel_htile(ir_ref, mask_ref, irt_ref, mt_ref, irb_ref, mb_ref, o_ref):
    """H-tiled path: (1,1,TH,W) tile + 8-row halo blocks above/below."""
    h = pl.program_id(1)
    top_valid = jnp.where(h > 0, 1.0, 0.0)                       # image top edge
    bot_valid = jnp.where(h < pl.num_programs(1) - 1, 1.0, 0.0)  # image bottom edge
    g = ir_ref[...] * mask_ref[...]
    # halo row above = last row (7) of the 8-row block ending at the tile start,
    # halo row below = first row (0) of the 8-row block right after the tile.
    g_above = irt_ref[:, :, 7:8, :] * mt_ref[:, :, 7:8, :] * top_valid
    g_below = irb_ref[:, :, 0:1, :] * mb_ref[:, :, 0:1, :] * bot_valid
    o_ref[...] = _sobel_core(g, g_above, g_below).astype(o_ref.dtype)


def _pick_h_tile(H, W):
    """Largest multiple-of-8 divisor of H whose working set fits the VMEM budget."""
    if H % 8 != 0:
        return H  # TODO(synk): H not a multiple of 8 falls back to whole-image blocks
    row_bytes = W * 4 * _LIVE_ARRAYS
    if H * row_bytes <= _VMEM_BUDGET:
        return H
    cap = max(8, _VMEM_BUDGET // row_bytes)
    for th in range(cap - cap % 8, 7, -8):
        if H % th == 0:
            return th
    return H


def sobel_conv_layer(ir, mask, *, h_tile=None):
    """ir, mask: (N, 1, H, W). Returns |sobel_x(ir*mask)| + |sobel_y(ir*mask)| (f32)."""
    N, C, H, W = ir.shape
    assert C == 1, "SobelConvLayer is defined for a single input channel"
    assert mask.shape == ir.shape

    TH = h_tile if h_tile is not None else _pick_h_tile(H, W)
    assert H % TH == 0 and (TH == H or (TH % 8 == 0 and H % 8 == 0)), \
        "h_tile must divide H; the tiled path needs 8-row alignment"

    out_shape = jax.ShapeDtypeStruct((N, 1, H, W), jnp.float32)

    def cparams(sem):
        return pltpu.CompilerParams(dimension_semantics=sem,
                                    vmem_limit_bytes=_VMEM_LIMIT_BYTES)

    if TH == H:
        # Whole-image blocks; pack the whole batch into one block when it fits
        # (single grid step for tiny inputs like the 16x16 test case).
        row_bytes = W * 4 * _LIVE_ARRAYS
        BN = N if N * H * row_bytes <= _VMEM_BUDGET else 1
        spec = pl.BlockSpec((BN, 1, H, W), lambda n: (n, 0, 0, 0))
        return pl.pallas_call(
            _sobel_kernel_whole,
            out_shape=out_shape,
            grid=(N // BN,),
            in_specs=[spec, spec],
            out_specs=spec,
            compiler_params=cparams(("parallel",)),
        )(ir, mask)

    # H-tiled path: small per-step VMEM (v7x 64 MiB) and 2-D parallel grid so
    # both v7x TensorCores have work even at batch 1.
    t8, h8 = TH // 8, H // 8
    tile_spec = pl.BlockSpec((1, 1, TH, W), lambda n, h: (n, 0, h, 0))
    top_spec = pl.BlockSpec(
        (1, 1, 8, W), lambda n, h: (n, 0, jnp.maximum(h * t8 - 1, 0), 0))
    bot_spec = pl.BlockSpec(
        (1, 1, 8, W), lambda n, h: (n, 0, jnp.minimum((h + 1) * t8, h8 - 1), 0))
    return pl.pallas_call(
        _sobel_kernel_htile,
        out_shape=out_shape,
        grid=(N, H // TH),
        in_specs=[tile_spec, tile_spec, top_spec, top_spec, bot_spec, bot_spec],
        out_specs=tile_spec,
        compiler_params=cparams(("parallel", "parallel")),
    )(ir, mask, ir, mask, ir, mask)


def _reference(ir, mask):
    """Pure-JAX reference (lax.conv) matching F.conv2d(padding=1)."""
    kx = jnp.array([[-1., 0., 1.], [-2., 0., 2.], [-1., 0., 1.]],
                   jnp.float32).reshape(1, 1, 3, 3)
    ky = jnp.array([[1., 2., 1.], [0., 0., 0.], [-1., -2., -1.]],
                   jnp.float32).reshape(1, 1, 3, 3)
    g = ir * mask

    def conv(x, w):
        return jax.lax.conv_general_dilated(
            x, w, window_strides=(1, 1), padding=((1, 1), (1, 1)),
            dimension_numbers=("NCHW", "OIHW", "NCHW"))

    return jnp.abs(conv(g, kx)) + jnp.abs(conv(g, ky))


if __name__ == "__main__":
    key = jax.random.PRNGKey(0)
    k1, k2, k3, k4 = jax.random.split(key, 4)

    # 1) Shapes implied by the module: N=2, C=1, 16x16 -> single-block path.
    ir = jax.random.normal(k1, (2, 1, 16, 16), jnp.float32)
    mask = (jax.random.uniform(k2, (2, 1, 16, 16)) > 0.5).astype(jnp.float32)
    out = jax.block_until_ready(sobel_conv_layer(ir, mask))
    ref = jax.block_until_ready(_reference(ir, mask))
    np.testing.assert_allclose(np.asarray(out), np.asarray(ref), rtol=1e-5, atol=1e-5)
    assert out.shape == (2, 1, 16, 16)

    # 2) Exercise the H-tiled (halo) path at a small, lane-dense size.
    ir2 = jax.random.normal(k3, (1, 1, 32, 128), jnp.float32)
    mask2 = (jax.random.uniform(k4, (1, 1, 32, 128)) > 0.5).astype(jnp.float32)
    out2 = jax.block_until_ready(sobel_conv_layer(ir2, mask2, h_tile=16))
    ref2 = jax.block_until_ready(_reference(ir2, mask2))
    np.testing.assert_allclose(np.asarray(out2), np.asarray(ref2), rtol=1e-5, atol=1e-5)

    print("KERNEL_OK")
</pallas_src>

<mosaic_0001>
module attributes {stable_mosaic.version = 11 : i64} {
  func.func @_sobel_kernel_whole(%arg0: i32, %arg1: memref<2x1x16x16xf32, #tpu.memory_space<vmem>>, %arg2: memref<2x1x16x16xf32, #tpu.memory_space<vmem>>, %arg3: memref<2x1x16x16xf32, #tpu.memory_space<vmem>>) attributes {dimension_semantics = [#tpu.dimension_semantics<parallel>], iteration_bounds = array<i64: 1>, scalar_prefetch = 0 : i64, scratch_operands = 0 : i64, tpu.core_type = #tpu.core_type<tc>, window_params = [{transform_indices = @transform_0, window_bounds = array<i64: 2, 1, 16, 16>}, {transform_indices = @transform_1, window_bounds = array<i64: 2, 1, 16, 16>}, {transform_indices = @transform_2, window_bounds = array<i64: 2, 1, 16, 16>}]} {
    %c0 = arith.constant 0 : index
    %c0_0 = arith.constant 0 : index
    %c0_1 = arith.constant 0 : index
    %c0_2 = arith.constant 0 : index
    %0 = vector.load %arg1[%c0, %c0_0, %c0_1, %c0_2] : memref<2x1x16x16xf32, #tpu.memory_space<vmem>>, vector<2x1x16x16xf32>
    %c0_3 = arith.constant 0 : index
    %c0_4 = arith.constant 0 : index
    %c0_5 = arith.constant 0 : index
    %c0_6 = arith.constant 0 : index
    %1 = vector.load %arg2[%c0_3, %c0_4, %c0_5, %c0_6] : memref<2x1x16x16xf32, #tpu.memory_space<vmem>>, vector<2x1x16x16xf32>
    %2 = arith.mulf %0, %1 : vector<2x1x16x16xf32>
    %cst = arith.constant 0.000000e+00 : f32
    %3 = vector.broadcast %cst : f32 to vector<2x1x1x16xf32>
    %4 = tpu.iota {dimensions = array<i32: 3>} : vector<2x1x16x16xi32>
    %c15_i32 = arith.constant 15 : i32
    %5 = vector.broadcast %c15_i32 : i32 to vector<2x1x16x16xi32>
    %6 = arith.cmpi eq, %4, %5 : vector<2x1x16x16xi32>
    %c15_i32_7 = arith.constant 15 : i32
    %7 = tpu.dynamic_rotate %2 by %c15_i32_7 dim 3 : vector<2x1x16x16xf32>, i32 -> vector<2x1x16x16xf32>
    %cst_8 = arith.constant 0.000000e+00 : f32
    %8 = vector.broadcast %cst_8 : f32 to vector<2x1x16x16xf32>
    %9 = arith.select %6, %8, %7 : vector<2x1x16x16xi1>, vector<2x1x16x16xf32>
    %10 = tpu.iota {dimensions = array<i32: 3>} : vector<2x1x16x16xi32>
    %c0_i32 = arith.constant 0 : i32
    %11 = vector.broadcast %c0_i32 : i32 to vector<2x1x16x16xi32>
    %12 = arith.cmpi eq, %10, %11 : vector<2x1x16x16xi32>
    %c1_i32 = arith.constant 1 : i32
    %13 = tpu.dynamic_rotate %2 by %c1_i32 dim 3 : vector<2x1x16x16xf32>, i32 -> vector<2x1x16x16xf32>
    %cst_9 = arith.constant 0.000000e+00 : f32
    %14 = vector.broadcast %cst_9 : f32 to vector<2x1x16x16xf32>
    %15 = arith.select %12, %14, %13 : vector<2x1x16x16xi1>, vector<2x1x16x16xf32>
    %16 = arith.subf %9, %15 : vector<2x1x16x16xf32>
    %cst_10 = arith.constant 2.000000e+00 : f32
    %17 = vector.broadcast %cst_10 : f32 to vector<2x1x16x16xf32>
    %18 = arith.mulf %17, %2 : vector<2x1x16x16xf32>
    %19 = arith.addf %15, %18 : vector<2x1x16x16xf32>
    %20 = arith.addf %19, %9 : vector<2x1x16x16xf32>
    %21 = tpu.iota {dimensions = array<i32: 3>} : vector<2x1x1x16xi32>
    %c15_i32_11 = arith.constant 15 : i32
    %22 = vector.broadcast %c15_i32_11 : i32 to vector<2x1x1x16xi32>
    %23 = arith.cmpi eq, %21, %22 : vector<2x1x1x16xi32>
    %c15_i32_12 = arith.constant 15 : i32
    %24 = tpu.dynamic_rotate %3 by %c15_i32_12 dim 3 : vector<2x1x1x16xf32>, i32 -> vector<2x1x1x16xf32>
    %cst_13 = arith.constant 0.000000e+00 : f32
    %25 = vector.broadcast %cst_13 : f32 to vector<2x1x1x16xf32>
    %26 = arith.select %23, %25, %24 : vector<2x1x1x16xi1>, vector<2x1x1x16xf32>
    %27 = tpu.iota {dimensions = array<i32: 3>} : vector<2x1x1x16xi32>
    %c0_i32_14 = arith.constant 0 : i32
    %28 = vector.broadcast %c0_i32_14 : i32 to vector<2x1x1x16xi32>
    %29 = arith.cmpi eq, %27, %28 : vector<2x1x1x16xi32>
    %c1_i32_15 = arith.constant 1 : i32
    %30 = tpu.dynamic_rotate %3 by %c1_i32_15 dim 3 : vector<2x1x1x16xf32>, i32 -> vector<2x1x1x16xf32>
    %cst_16 = arith.constant 0.000000e+00 : f32
    %31 = vector.broadcast %cst_16 : f32 to vector<2x1x1x16xf32>
    %32 = arith.select %29, %31, %30 : vector<2x1x1x16xi1>, vector<2x1x1x16xf32>
    %33 = arith.subf %26, %32 : vector<2x1x1x16xf32>
    %cst_17 = arith.constant 2.000000e+00 : f32
    %34 = vector.broadcast %cst_17 : f32 to vector<2x1x1x16xf32>
    %35 = arith.mulf %34, %3 : vector<2x1x1x16xf32>
    %36 = arith.addf %32, %35 : vector<2x1x1x16xf32>
    %37 = arith.addf %36, %26 : vector<2x1x1x16xf32>
    %38 = tpu.iota {dimensions = array<i32: 3>} : vector<2x1x1x16xi32>
    %c15_i32_18 = arith.constant 15 : i32
    %39 = vector.broadcast %c15_i32_18 : i32 to vector<2x1x1x16xi32>
    %40 = arith.cmpi eq, %38, %39 : vector<2x1x1x16xi32>
    %c15_i32_19 = arith.constant 15 : i32
    %41 = tpu.dynamic_rotate %3 by %c15_i32_19 dim 3 : vector<2x1x1x16xf32>, i32 -> vector<2x1x1x16xf32>
    %cst_20 = arith.constant 0.000000e+00 : f32
    %42 = vector.broadcast %cst_20 : f32 to vector<2x1x1x16xf32>
    %43 = arith.select %40, %42, %41 : vector<2x1x1x16xi1>, vector<2x1x1x16xf32>
    %44 = tpu.iota {dimensions = array<i32: 3>} : vector<2x1x1x16xi32>
    %c0_i32_21 = arith.constant 0 : i32
    %45 = vector.broadcast %c0_i32_21 : i32 to vector<2x1x1x16xi32>
    %46 = arith.cmpi eq, %44, %45 : vector<2x1x1x16xi32>
    %c1_i32_22 = arith.constant 1 : i32
    %47 = tpu.dynamic_rotate %3 by %c1_i32_22 dim 3 : vector<2x1x1x16xf32>, i32 -> vector<2x1x1x16xf32>
    %cst_23 = arith.constant 0.000000e+00 : f32
    %48 = vector.broadcast %cst_23 : f32 to vector<2x1x1x16xf32>
    %49 = arith.select %46, %48, %47 : vector<2x1x1x16xi1>, vector<2x1x1x16xf32>
    %50 = arith.subf %43, %49 : vector<2x1x1x16xf32>
    %cst_24 = arith.constant 2.000000e+00 : f32
    %51 = vector.broadcast %cst_24 : f32 to vector<2x1x1x16xf32>
    %52 = arith.mulf %51, %3 : vector<2x1x1x16xf32>
    %53 = arith.addf %49, %52 : vector<2x1x1x16xf32>
    %54 = arith.addf %53, %43 : vector<2x1x1x16xf32>
    %55 = tpu.iota {dimensions = array<i32: 2>} : vector<2x1x16x16xi32>
    %c0_i32_25 = arith.constant 0 : i32
    %56 = vector.broadcast %c0_i32_25 : i32 to vector<2x1x16x16xi32>
    %57 = arith.cmpi eq, %55, %56 : vector<2x1x16x16xi32>
    %c1_i32_26 = arith.constant 1 : i32
    %58 = tpu.dynamic_rotate %16 by %c1_i32_26 dim 2 : vector<2x1x16x16xf32>, i32 -> vector<2x1x16x16xf32>
    %59 = vector.shape_cast %33 : vector<2x1x1x16xf32> to vector<2x1x1x16xf32>
    %60 = vector.broadcast %59 : vector<2x1x1x16xf32> to vector<2x1x16x16xf32>
    %61 = arith.select %57, %60, %58 : vector<2x1x16x16xi1>, vector<2x1x16x16xf32>
    %cst_27 = arith.constant 2.000000e+00 : f32
    %62 = vector.broadcast %cst_27 : f32 to vector<2x1x16x16xf32>
    %63 = arith.mulf %62, %16 : vector<2x1x16x16xf32>
    %64 = arith.addf %61, %63 : vector<2x1x16x16xf32>
    %c15_i32_28 = arith.constant 15 : i32
    %65 = vector.broadcast %c15_i32_28 : i32 to vector<2x1x16x16xi32>
    %66 = arith.cmpi eq, %55, %65 : vector<2x1x16x16xi32>
    %c15_i32_29 = arith.constant 15 : i32
    %67 = tpu.dynamic_rotate %16 by %c15_i32_29 dim 2 : vector<2x1x16x16xf32>, i32 -> vector<2x1x16x16xf32>
    %68 = vector.shape_cast %50 : vector<2x1x1x16xf32> to vector<2x1x1x16xf32>
    %69 = vector.broadcast %68 : vector<2x1x1x16xf32> to vector<2x1x16x16xf32>
    %70 = arith.select %66, %69, %67 : vector<2x1x16x16xi1>, vector<2x1x16x16xf32>
    %71 = arith.addf %64, %70 : vector<2x1x16x16xf32>
    %c0_i32_30 = arith.constant 0 : i32
    %72 = vector.broadcast %c0_i32_30 : i32 to vector<2x1x16x16xi32>
    %73 = arith.cmpi eq, %55, %72 : vector<2x1x16x16xi32>
    %c1_i32_31 = arith.constant 1 : i32
    %74 = tpu.dynamic_rotate %20 by %c1_i32_31 dim 2 : vector<2x1x16x16xf32>, i32 -> vector<2x1x16x16xf32>
    %75 = vector.shape_cast %37 : vector<2x1x1x16xf32> to vector<2x1x1x16xf32>
    %76 = vector.broadcast %75 : vector<2x1x1x16xf32> to vector<2x1x16x16xf32>
    %77 = arith.select %73, %76, %74 : vector<2x1x16x16xi1>, vector<2x1x16x16xf32>
    %c15_i32_32 = arith.constant 15 : i32
    %78 = vector.broadcast %c15_i32_32 : i32 to vector<2x1x16x16xi32>
    %79 = arith.cmpi eq, %55, %78 : vector<2x1x16x16xi32>
    %c15_i32_33 = arith.constant 15 : i32
    %80 = tpu.dynamic_rotate %20 by %c15_i32_33 dim 2 : vector<2x1x16x16xf32>, i32 -> vector<2x1x16x16xf32>
    %81 = vector.shape_cast %54 : vector<2x1x1x16xf32> to vector<2x1x1x16xf32>
    %82 = vector.broadcast %81 : vector<2x1x1x16xf32> to vector<2x1x16x16xf32>
    %83 = arith.select %79, %82, %80 : vector<2x1x16x16xi1>, vector<2x1x16x16xf32>
    %84 = arith.subf %77, %83 : vector<2x1x16x16xf32>
    %85 = math.absf %71 : vector<2x1x16x16xf32>
    %86 = math.absf %84 : vector<2x1x16x16xf32>
    %87 = arith.addf %85, %86 : vector<2x1x16x16xf32>
    %c0_34 = arith.constant 0 : index
    %c0_35 = arith.constant 0 : index
    %c0_36 = arith.constant 0 : index
    %c0_37 = arith.constant 0 : index
    %88 = vector.load %arg3[%c0_34, %c0_35, %c0_36, %c0_37] : memref<2x1x16x16xf32, #tpu.memory_space<vmem>>, vector<2x1x16x16xf32>
    tpu.vector_store %arg3[%c0_34, %c0_35, %c0_36, %c0_37], %87 {strides = array<i32>} : memref<2x1x16x16xf32, #tpu.memory_space<vmem>>, vector<2x1x16x16xf32>,
    return
  }
  func.func @transform_0(%arg0: i32) -> (i32, i32, i32, i32) {
    %c0_i32 = arith.constant 0 : i32
    %c0_i32_0 = arith.constant 0 : i32
    %c0_i32_1 = arith.constant 0 : i32
    %c0_i32_2 = arith.constant 0 : i32
    return %arg0, %c0_i32, %c0_i32_0, %c0_i32_1 : i32, i32, i32, i32
  }
  func.func @transform_1(%arg0: i32) -> (i32, i32, i32, i32) {
    %c0_i32 = arith.constant 0 : i32
    %c0_i32_0 = arith.constant 0 : i32
    %c0_i32_1 = arith.constant 0 : i32
    %c0_i32_2 = arith.constant 0 : i32
    return %arg0, %c0_i32, %c0_i32_0, %c0_i32_1 : i32, i32, i32, i32
  }
  func.func @transform_2(%arg0: i32) -> (i32, i32, i32, i32) {
    %c0_i32 = arith.constant 0 : i32
    %c0_i32_0 = arith.constant 0 : i32
    %c0_i32_1 = arith.constant 0 : i32
    %c0_i32_2 = arith.constant 0 : i32
    return %arg0, %c0_i32, %c0_i32_0, %c0_i32_1 : i32, i32, i32, i32
  }
}

</mosaic_0001>

<bundles_post_ra>
// kernel: tpu_custom_call.1
= control target key start
LH: loop header
LB: loop body
LE: loop exit
PB: predicated region body
PF: predicated region fallthrough
CT: control target
= control target key end

     0   :  { %7 = vsyncpa [#allocation3], 0  ;;  %s509_s0 = inlined_call_operand.hbm [shape: f32[2,1,16,16], index: 0, kind: input, shape index: {}]   ;;  %s510_s1 = inlined_call_operand.hbm [shape: f32[2,1,16,16], index: 1, kind: input, shape index: {}]   ;;  %s511_s2 = inlined_call_operand.hbm [shape: f32[2,1,16,16], index: 2, kind: output, shape index: {}]  }
   0x1   :  { %8 = vsyncpa [#allocation6], 0 }
   0x2   :  { %9 = vsyncpa [#allocation4], 0  ;;  %s14_s11 = sshll.u32 %s509_s0, 4  ;;  %s354_s12 = smov [#allocation2]   ;;  %s15_s11 = int_to_ptr.hbm [resolvable:$true] %s14_s11 }
   0x3   :  { %s16_s13 = sshll.u32 %s354_s12, 4  ;;  %s27_s16 = sshll.u32 %s510_s1, 4  ;;  %s17_s13 = int_to_ptr.vmem [resolvable:$true] %s16_s13  ;;  %s28_s16 = int_to_ptr.hbm [resolvable:$true] %s27_s16 }
   0x4   :  { %s355_s17 = smov 128   ;;  %s356_s18 = smov 8  }
   0x5   :  { %22 = dma.hbm_to_vmem [thread:$0]  %s15_s11, 512, %s17_s13, [#allocation3], %s355_s17, %s355_s17, %s356_s18  }
   0x6   :  { %s357_s19 = smov [#allocation5]  }
   0x7   :  { %s29_s20 = sshll.u32 %s357_s19, 4  ;;  %s30_s20 = int_to_ptr.vmem [resolvable:$true] %s29_s20 }
   0x8   :  { %35 = dma.hbm_to_vmem [thread:$0]  %s28_s16, 512, %s30_s20, [#allocation6], %s355_s17, %s355_s17, %s356_s18  }
   0x9   :  { %348 = dma.done.wait [#allocation3], 512  }
   0xa   :  { %349 = vsyncadd [#allocation3], 4294966784 }
   0xb   :  { %350 = dma.done.wait [#allocation6], 512  }
   0xc   :  { %351 = vsyncadd [#allocation6], 4294966784  ;;  %v358_v0 = vmov 0.0   ;;  %s359_s0 = smov 16   ;;  %v46_v1 = vld [vmem:[#allocation2 + $0x10] sm:$0xff]  ;;  %v44_v3 = vld [vmem:[#allocation2] sm:$0xff]  ;;  %v56_v37 = vlaneseq }
   0xd   :  { %137 = vrot.lane.b32.xlu2 %v358_v0, %s359_s0  ;;  %v50_v2 = vld [vmem:[#allocation5 + $0x10] sm:$0xff]  ;;  %v48_v5 = vld [vmem:[#allocation5] sm:$0xff]  ;;  %v47_v7 = vld [vmem:[#allocation2 + $0x18] sm:$0xff]  ;;  %vm59_vm0 = vcmask 1047680   ;;  %s360_s1 = smov 127   ;;  %s361_s21 = smov 113  }
   0xe   :  { %v391_v4 = vmul.f32 %v50_v2, %v46_v1  ;;  %v52_v6 = vmul.f32 %v48_v5, %v44_v3  ;;  %v51_v8 = vld [vmem:[#allocation5 + $0x18] sm:$0xff]  ;;  %v45_v9 = vld [vmem:[#allocation2 + $0x8] sm:$0xff]  ;;  %v420_v38 = vand.u32 127, %v56_v37  ;;  %v435_v52 = vshrl.u32 %v56_v37, 7  ;;  %s362_s22 = smov [#allocation7]   ;;  %s253_s26 = sshll.u32 %s511_s2, 4  ;;  %s254_s26 = int_to_ptr.hbm [resolvable:$true] %s253_s26 }
   0xf   :  { %v49_v10 = vld [vmem:[#allocation5 + $0x8] sm:$0xff]  ;;  %v55_v11 = vmul.f32 %v51_v8, %v47_v7  ;;  %vm242_vm7 = vcmask 130048   ;;  %s251_s23 = sshll.u32 %s362_s22, 4  ;;  %s252_s23 = int_to_ptr.vmem [resolvable:$true] %s251_s23 }
  0x10   :  { %66 = vrot.lane.b32.xlu1 %v391_v4, %s359_s0  ;;  %60 = vrot.lane.b32.xlu0 %v52_v6, %s359_s0  ;;  %v396_v12 = vmul.f32 %v49_v10, %v45_v9  ;;  %vm104_vm1 = vcmp.eq.s32.totalorder %v420_v38, 0  ;;  %vm58_vm2 = vcmp.eq.s32.totalorder %v420_v38, 15  ;;  %v125_v42 = vmul.f32 2.0, %v52_v6 }
  0x11   :  { %v127_v48 = vmul.f32 2.0, %v391_v4  ;;  %v128_v49 = vmul.f32 2.0, %v55_v11  ;;  %v441_v60 = vadd.s32 8, %v435_v52  ;;  %vm164_vm3 = vcmp.lt.s32.totalorder %v435_v52, 1 }
  0x12   :  { %v126_v54 = vmul.f32 2.0, %v396_v12  ;;  %vm188_vm4 = vcmp.lt.s32.totalorder %v435_v52, 7  ;;  %vm158_vm5 = vcmp.eq.s32.totalorder %v435_v52, 0 }
  0x13   :  { %vm183_vm6 = vcmp.eq.s32.totalorder %v441_v60, 15 }
  0x18   :  { %69 = vrot.lane.b32.xlu1 %v55_v11, %s359_s0  ;;  %63 = vrot.lane.b32.xlu0 %v396_v12, %s359_s0 }
  0x67   :  { %v138_v21 = vpop.permute.xlu2 %137 }
  0x68   :  { %v139_v22 = vsel %vm59_vm0, %v138_v21, 0.0 }
  0x82   :  { %v67_v13 = vpop.permute.xlu1 %66  ;;  %v61_v14 = vpop.permute.xlu0 %60 }
  0x83   :  { %v68_v15 = vsel %vm59_vm0, %v67_v13, %v391_v4  ;;  %v62_v16 = vsel %vm59_vm0, %v61_v14, %v52_v6 }
  0x84   :  { %76 = vrot.lane.b32.xlu1 %v68_v15, %s359_s0  ;;  %72 = vrot.lane.b32.xlu2 %v62_v16, %s359_s0 }
  0x8a   :  { %v70_v17 = vpop.permute.xlu1 %69  ;;  %v64_v18 = vpop.permute.xlu0 %63 }
  0x8b   :  { %v71_v19 = vsel %vm59_vm0, %v70_v17, %v55_v11  ;;  %v65_v20 = vsel %vm59_vm0, %v64_v18, %v396_v12 }
  0x8c   :  { %74 = vrot.lane.b32.xlu0 %v65_v20, %s359_s0  ;;  %78 = vrot.lane.b32.xlu2 %v71_v19, %s359_s0 }
  0x94   :  { %140 = vrot.lane.b32.xlu0 %v139_v22, %s359_s0 }
  0xde   :  { %v73_v23 = vpop.permute.xlu2 %72 }
  0xdf   :  { %v80_v24 = vsel %vm59_vm0, %v73_v23, %v52_v6 }
  0xe0   :  { %88 = vrot.lane.b32.xlu1 %v80_v24, %s360_s1 }
  0xe6   :  { %v79_v25 = vpop.permute.xlu2 %78 }
  0xe7   :  { %v83_v26 = vsel %vm59_vm0, %v79_v25, %v55_v11 }
  0xe8   :  { %94 = vrot.lane.b32.xlu1 %v83_v26, %s360_s1 }
  0xf6   :  { %v77_v27 = vpop.permute.xlu1 %76 }
  0xf7   :  { %v82_v28 = vsel %vm59_vm0, %v77_v27, %v391_v4 }
  0xf8   :  { %109 = vrot.lane.b32.xlu1 %v82_v28, %s361_s21  ;;  %92 = vrot.lane.b32.xlu0 %v82_v28, %s360_s1 }
  0xfe   :  { %v75_v29 = vpop.permute.xlu0 %74 }
  0xff   :  { %v81_v30 = vsel %vm59_vm0, %v75_v29, %v396_v12 }
 0x100   :  { %107 = vrot.lane.b32.xlu0 %v81_v30, %s361_s21  ;;  %90 = vrot.lane.b32.xlu2 %v81_v30, %s360_s1 }
 0x106   :  { %v141_v31 = vpop.permute.xlu0 %140 }
 0x107   :  { %v142_v32 = vsel %vm59_vm0, %v141_v31, 0.0 }
 0x108   :  { %105 = vrot.lane.b32.xlu2 %v80_v24, %s361_s21  ;;  %148 = vrot.lane.b32.xlu1 %v142_v32, %s361_s21 }
 0x109   :  { %144 = vrot.lane.b32.xlu0 %v142_v32, %s360_s1 }
 0x110   :  { %111 = vrot.lane.b32.xlu2 %v83_v26, %s361_s21 }
 0x152   :  { %v89_v33 = vpop.permute.xlu1 %88 }
 0x153   :  { %v100_v55 = vsel %vm58_vm2, 0.0, %v89_v33 }
 0x15a   :  { %v91_v34 = vpop.permute.xlu2 %90  ;;  %v95_v35 = vpop.permute.xlu1 %94 }
 0x15b   :  { %v103_v43 = vsel %vm58_vm2, 0.0, %v95_v35  ;;  %v101_v61 = vsel %vm58_vm2, 0.0, %v91_v34 }
 0x162   :  { %v106_v36 = vpop.permute.xlu2 %105 }
 0x163   :  { %v117_v47 = vsel %vm104_vm1, 0.0, %v106_v36 }
 0x164   :  { %v129_v53 = vadd.f32 %v125_v42, %v117_v47  ;;  %v121_v58 = vsub.f32 %v100_v55, %v117_v47 }
 0x166   :  { %v133_v1 = vadd.f32 %v129_v53, %v100_v55  ;;  %v160_v6 = vrot.slane %v121_v58, 7  ;;  %v174_v7 = vmul.f32 2.0, %v121_v58  ;;  %v184_v13 = vrot.slane %v121_v58, 1 }
 0x168   :  { %v201_v14 = vrot.slane %v133_v1, 7  ;;  %v214_v15 = vrot.slane %v133_v1, 1 }
 0x16a   :  { %v110_v39 = vpop.permute.xlu1 %109  ;;  %v93_v40 = vpop.permute.xlu0 %92 }
 0x16b   :  { %v112_v41 = vpop.permute.xlu2 %111  ;;  %v119_v44 = vsel %vm104_vm1, 0.0, %v110_v39  ;;  %v102_v46 = vsel %vm58_vm2, 0.0, %v93_v40 }
 0x16c   :  { %v120_v45 = vsel %vm104_vm1, 0.0, %v112_v41  ;;  %v123_v51 = vsub.f32 %v102_v46, %v119_v44  ;;  %v131_v56 = vadd.f32 %v127_v48, %v119_v44 }
 0x16d   :  { %v124_v50 = vsub.f32 %v103_v43, %v120_v45  ;;  %v132_v57 = vadd.f32 %v128_v49, %v120_v45 }
 0x16e   :  { %v161_v63 = vrot.slane %v123_v51, 7  ;;  %v135_v5 = vadd.f32 %v131_v56, %v102_v46  ;;  %v185_v11 = vrot.slane %v123_v51, 1  ;;  %v176_v18 = vmul.f32 2.0, %v123_v51 }
 0x16f   :  { %v163_v62 = vrot.slane %v124_v50, 7  ;;  %v136_v4 = vadd.f32 %v132_v57, %v103_v43  ;;  %v177_v8 = vmul.f32 2.0, %v124_v50  ;;  %v187_v9 = vrot.slane %v124_v50, 1 }
 0x170   :  { %v202_v19 = vrot.slane %v135_v5, 7  ;;  %v215_v20 = vrot.slane %v135_v5, 1 }
 0x171   :  { %v166_v10 = vsel %vm164_vm3, %v161_v63, %v163_v62  ;;  %v204_v17 = vrot.slane %v136_v4, 7  ;;  %v217_v21 = vrot.slane %v136_v4, 1  ;;  %v168_v22 = vsel %vm164_vm3, %v163_v62, %v161_v63 }
 0x172   :  { %v108_v59 = vpop.permute.xlu0 %107  ;;  %v181_v23 = vadd.f32 %v177_v8, %v166_v10  ;;  %v190_v26 = vsel %vm188_vm4, %v185_v11, %v187_v9  ;;  %v192_v27 = vsel %vm188_vm4, %v187_v9, %v185_v11 }
 0x173   :  { %v118_v0 = vsel %vm104_vm1, 0.0, %v108_v59  ;;  %v206_v35 = vsel %vm164_vm3, %v202_v19, %v204_v17  ;;  %v208_v36 = vsel %vm164_vm3, %v204_v17, %v202_v19  ;;  %v219_v40 = vsel %vm188_vm4, %v215_v20, %v217_v21 }
 0x174   :  { %v122_v2 = vsub.f32 %v101_v61, %v118_v0  ;;  %v130_v3 = vadd.f32 %v126_v54, %v118_v0  ;;  %v221_v41 = vsel %vm188_vm4, %v217_v21, %v215_v20 }
 0x176   :  { %v162_v12 = vrot.slane %v122_v2, 7  ;;  %v134_v16 = vadd.f32 %v130_v3, %v101_v61  ;;  %v186_v24 = vrot.slane %v122_v2, 1  ;;  %v175_v29 = vmul.f32 2.0, %v122_v2 }
 0x178   :  { %v165_v28 = vsel %vm164_vm3, %v160_v6, %v162_v12  ;;  %v203_v31 = vrot.slane %v134_v16, 7  ;;  %v216_v32 = vrot.slane %v134_v16, 1  ;;  %v167_v42 = vsel %vm164_vm3, %v162_v12, %v160_v6 }
 0x179   :  { %v189_v38 = vsel %vm188_vm4, %v184_v13, %v186_v24  ;;  %v179_v43 = vadd.f32 %v175_v29, %v165_v28  ;;  %v191_v44 = vsel %vm188_vm4, %v186_v24, %v184_v13 }
 0x17a   :  { %v149_v25 = vpop.permute.xlu1 %148  ;;  %v205_v47 = vsel %vm164_vm3, %v201_v14, %v203_v31  ;;  %v207_v48 = vsel %vm164_vm3, %v203_v31, %v201_v14  ;;  %v218_v49 = vsel %vm188_vm4, %v214_v15, %v216_v32  ;;  %v220_v50 = vsel %vm188_vm4, %v216_v32, %v214_v15 }
 0x17b   :  { %v145_v30 = vpop.permute.xlu0 %144  ;;  %v151_v33 = vsel %vm104_vm1, 0.0, %v149_v25 }
 0x17c   :  { %v147_v34 = vsel %vm58_vm2, 0.0, %v145_v30 }
 0x17d   :  { %v152_v37 = vsub.f32 %v147_v34, %v151_v33  ;;  %v154_v39 = vadd.f32 %v151_v33, %v147_v34 }
 0x17f   :  { %v169_v45 = vperm.slane %v152_v37, 0  ;;  %v209_v46 = vperm.slane %v154_v39, 0 }
 0x181   :  { %v170_v51 = vsel %vm158_vm5, %v169_v45, %v167_v42  ;;  %v172_v53 = vsel %vm158_vm5, %v169_v45, %v168_v22  ;;  %v194_v54 = vsel %vm183_vm6, %v169_v45, %v191_v44  ;;  %v196_v55 = vsel %vm183_vm6, %v169_v45, %v192_v27 }
 0x182   :  { %v178_v56 = vadd.f32 %v174_v7, %v170_v51  ;;  %v180_v57 = vadd.f32 %v176_v18, %v172_v53  ;;  %v198_v58 = vadd.f32 %v194_v54, %v179_v43  ;;  %v200_v59 = vadd.f32 %v196_v55, %v181_v23 }
 0x183   :  { %v210_v61 = vsel %vm158_vm5, %v209_v46, %v207_v48  ;;  %v212_v62 = vsel %vm158_vm5, %v209_v46, %v208_v36  ;;  %v223_v63 = vsel %vm183_vm6, %v209_v46, %v220_v50  ;;  %v225_v0 = vsel %vm183_vm6, %v209_v46, %v221_v41 }
 0x184   :  { %v197_v1 = vadd.f32 %v189_v38, %v178_v56  ;;  %v199_v2 = vadd.f32 %v190_v26, %v180_v57  ;;  %v226_v3 = vsub.f32 %v210_v61, %v218_v49  ;;  %v227_v4 = vsub.f32 %v205_v47, %v223_v63 }
 0x185   :  { %v228_v5 = vsub.f32 %v212_v62, %v219_v40  ;;  %v229_v6 = vsub.f32 %v206_v35, %v225_v0  ;;  %v231_v7 = vand.u32 2147483647, %v198_v58  ;;  %v233_v8 = vand.u32 2147483647, %v200_v59 }
 0x186   :  { %v230_v9 = vand.u32 2147483647, %v197_v1  ;;  %v232_v10 = vand.u32 2147483647, %v199_v2  ;;  %v234_v11 = vand.u32 2147483647, %v226_v3 }
 0x187   :  { %v235_v12 = vand.u32 2147483647, %v227_v4  ;;  %v236_v52 = vand.u32 2147483647, %v228_v5  ;;  %v237_v13 = vand.u32 2147483647, %v229_v6 }
 0x188   :  { %v238_v14 = vadd.f32 %v234_v11, %v230_v9 }
 0x189   :  { %v239_v60 = vadd.f32 %v235_v12, %v231_v7  ;;  %v240_v15 = vadd.f32 %v236_v52, %v232_v10  ;;  %v241_v16 = vadd.f32 %v237_v13, %v233_v8 }
 0x18a   :  { %243 = vst.msk [vmem:[#allocation7] sm:$0xff] %vm242_vm7, %v238_v14 }
 0x18b   :  { %244 = vst.msk [vmem:[#allocation7 + $0x8] sm:$0xff] %vm242_vm7, %v239_v60 }
 0x18c   :  { %245 = vst.msk [vmem:[#allocation7 + $0x10] sm:$0xff] %vm242_vm7, %v240_v15 }
 0x18d   :  { %246 = vst.msk [vmem:[#allocation7 + $0x18] sm:$0xff] %vm242_vm7, %v241_v16 }
 0x18e   :  { %259 = dma.vmem_to_hbm [thread:$0]  %s252_s23, 512, %s254_s26, [#allocation4], %s355_s17, %s355_s17, %s356_s18  }
 0x18f   :  { %352 = dma.done.wait [#allocation4], 512  }
 0x190   :  { %353 = vsyncadd [#allocation4], 4294966784 }
 0x191   :  { %264 = vsyncpa [#allocation3], 1 }
 0x192   :  { %265 = vsyncpa [#allocation6], 1 }
 0x193   :  { %266 = vsyncpa [#allocation4], 1 }

</bundles_post_ra>
